<compile_context>
chip_gen: v5e
topology: v5e:2x2
jax: 0.10.0
libtpu: 0.0.40
codegen_flags: <defaults>
</compile_context>

<pallas_src>
import jax
import jax.numpy as jnp
from jax.experimental import pallas as pl
from jax.experimental.pallas import tpu as pltpu

IN_DIM = 4
HIDDEN = 10
OUT_DIM = 1

LANE = 128            # lane width: batch tiles are multiples of this
MAX_TB = 128 * 1024   # biggest batch tile (~5.25 MiB double-buffered VMEM)
SPLIT_THRESHOLD = 32 * 1024   # above this, force >=2 grid steps (v7x 2-TC)


def _round_up(n, m):
    return ((n + m - 1) // m) * m


def policy_net_kernel(xt_ref, wf_ref, bf_ref, o_ref):
    """One batch tile of sigmoid(x @ Wf + bf), feature-major layout.

    xt_ref: (IN_DIM, TB) VMEM  -- batch on the lane axis (lane-dense loads)
    wf_ref: (IN_DIM, 1)  VMEM  -- collapsed weight, grid-invariant (resident)
    bf_ref: (1, 1)       VMEM  -- collapsed bias, grid-invariant (resident)
    o_ref : (1, TB)      VMEM  -- lane-dense output row (unmasked vst except
                                  for the edge-masked partial last tile)
    """
    xt = xt_ref[...]                     # (4, TB)
    wf = wf_ref[...]                     # (4, 1) -> lane-broadcast against xt
    # K=4 contraction on the VPU (one mul) + a sublane reduce on the XLU.
    # An MXU pass would waste a 128/256-deep systolic array on a 4-deep K.
    z = jnp.sum(xt * wf, axis=0, keepdims=True) + bf_ref[...]   # (1, TB)
    # exp issues on the EUP; exact reciprocal keeps numerics identical to
    # 1/(1+exp(-z)).  The kernel is memory-bound, so approx=True gains nothing.
    o_ref[...] = pl.reciprocal(1.0 + jnp.exp(-z), approx=False)


def collapse_params(params):
    """Fuse the three affine layers (no activation between them) into one.

    Call ONCE per parameter update, not once per forward call.
    """
    w1, b1, w2, b2, w3, b3 = params
    wf = w1 @ w2 @ w3                    # (4, 1)
    bf = (b1 @ w2 + b2) @ w3 + b3        # (1, 1)
    return wf, bf


def _batch_tile(B):
    """Pick the lane tile: single block for small batches, >=2 blocks above
    SPLIT_THRESHOLD (v7x core sharding), capped at MAX_TB (v5e VMEM default)."""
    bp = _round_up(max(B, 1), LANE)
    if bp <= SPLIT_THRESHOLD:
        return bp
    half = _round_up(-(-bp // 2), LANE)
    return min(half, MAX_TB)


def policy_net_forward_fm(xt, wf, bf):
    """Feature-major fast path: xt (4, B) float32 -> (1, B) float32.

    Use this directly if the rollout stores states feature-major -- it avoids
    any wrapper-side HBM transpose/pad copies on a purely input-BW-bound op.
    """
    B = xt.shape[1]
    tb = _batch_tile(B)
    grid = (pl.cdiv(B, tb),)   # partial last block is edge-masked by Pallas

    return pl.pallas_call(
        policy_net_kernel,
        out_shape=jax.ShapeDtypeStruct((OUT_DIM, B), jnp.float32),
        grid=grid,
        in_specs=[
            pl.BlockSpec((IN_DIM, tb), lambda i: (0, i)),       # x tile, streamed
            pl.BlockSpec((IN_DIM, OUT_DIM), lambda i: (0, 0)),  # Wf, VMEM-resident
            pl.BlockSpec((1, 1), lambda i: (0, 0)),             # bf, VMEM-resident
        ],
        out_specs=pl.BlockSpec((OUT_DIM, tb), lambda i: (0, i)),  # lane-dense row
        compiler_params=pltpu.CompilerParams(
            dimension_semantics=("parallel",),   # batch shards across TCs on v7x
        ),
    )(xt, wf, bf)


def policy_net_forward(x, wf, bf):
    """PyTorch-shaped API: x (B, 4) float32 -> (B, 1) float32.

    The transpose is pure layout plumbing (one copy); prefer
    policy_net_forward_fm if states are already feature-major.
    """
    B = x.shape[0]
    out_row = policy_net_forward_fm(x.T, wf, bf)   # (1, B)
    return out_row.reshape(B, OUT_DIM)


def init_params(key):
    """PyTorch Linear default init: U(-1/sqrt(fan_in), 1/sqrt(fan_in)).

    Weights stored as (in_dim, out_dim) (transposed vs. torch), biases (1, out).
    """
    ks = jax.random.split(key, 6)

    def uniform(k, shape, fan_in):
        bound = 1.0 / jnp.sqrt(jnp.float32(fan_in))
        return jax.random.uniform(k, shape, jnp.float32, -bound, bound)

    w1 = uniform(ks[0], (IN_DIM, HIDDEN), IN_DIM)
    b1 = uniform(ks[1], (1, HIDDEN), IN_DIM)
    w2 = uniform(ks[2], (HIDDEN, HIDDEN), HIDDEN)
    b2 = uniform(ks[3], (1, HIDDEN), HIDDEN)
    w3 = uniform(ks[4], (HIDDEN, OUT_DIM), HIDDEN)
    b3 = uniform(ks[5], (1, OUT_DIM), HIDDEN)
    return (w1, b1, w2, b2, w3, b3)


def reference_forward(x, params):
    """Un-collapsed reference: exactly the PyTorch forward pass."""
    w1, b1, w2, b2, w3, b3 = params
    h = x @ w1 + b1
    h = h @ w2 + b2
    z = h @ w3 + b3
    return jax.nn.sigmoid(z)


if __name__ == "__main__":
    key = jax.random.PRNGKey(0)
    k_x, k_p, k_x2 = jax.random.split(key, 3)

    params = init_params(k_p)
    # Hoisted out of the forward path: collapse once per parameter update.
    wf, bf = collapse_params(params)
    jax.block_until_ready((wf, bf))

    # Small per-env-step batch of CartPole-like 4-d state vectors.
    B_small = 8
    x_small = jax.random.normal(k_x, (B_small, IN_DIM), dtype=jnp.float32)
    out_small = jax.block_until_ready(policy_net_forward(x_small, wf, bf))
    ref_small = reference_forward(x_small, params)
    assert out_small.shape == (B_small, OUT_DIM)
    assert jnp.allclose(out_small, ref_small, atol=1e-5, rtol=1e-5), \
        "mismatch vs reference (small batch)"

    # Non-multiple-of-128 batch exercises the edge-masked partial last block
    # (no wrapper-side jnp.pad is used any more).
    B_odd = 300
    x_odd = jax.random.normal(k_x2, (B_odd, IN_DIM), dtype=jnp.float32)
    out_odd = jax.block_until_ready(policy_net_forward(x_odd, wf, bf))
    ref_odd = reference_forward(x_odd, params)
    assert out_odd.shape == (B_odd, OUT_DIM)
    assert jnp.allclose(out_odd, ref_odd, atol=1e-5, rtol=1e-5), \
        "mismatch vs reference (non-aligned batch)"

    print("KERNEL_OK")
</pallas_src>

<mosaic_0001>
module attributes {stable_mosaic.version = 11 : i64} {
  func.func @policy_net_kernel(%arg0: i32, %arg1: memref<4x128xf32, #tpu.memory_space<vmem>>, %arg2: memref<4x1xf32, #tpu.memory_space<vmem>>, %arg3: memref<1x1xf32, #tpu.memory_space<vmem>>, %arg4: memref<1x128xf32, #tpu.memory_space<vmem>>) attributes {dimension_semantics = [#tpu.dimension_semantics<parallel>], iteration_bounds = array<i64: 1>, scalar_prefetch = 0 : i64, scratch_operands = 0 : i64, tpu.core_type = #tpu.core_type<tc>, window_params = [{transform_indices = @transform_0, window_bounds = array<i64: 4, 128>}, {pipeline_mode = #tpu.pipeline_mode<synchronous>, transform_indices = @transform_1, window_bounds = array<i64: 4, 1>}, {pipeline_mode = #tpu.pipeline_mode<synchronous>, transform_indices = @transform_2, window_bounds = array<i64: 1, 1>}, {transform_indices = @transform_3, window_bounds = array<i64: 1, 128>}]} {
    %c0 = arith.constant 0 : index
    %c0_0 = arith.constant 0 : index
    %0 = vector.load %arg1[%c0, %c0_0] : memref<4x128xf32, #tpu.memory_space<vmem>>, vector<4x128xf32>
    %c0_1 = arith.constant 0 : index
    %c0_2 = arith.constant 0 : index
    %1 = vector.load %arg2[%c0_1, %c0_2] : memref<4x1xf32, #tpu.memory_space<vmem>>, vector<4x1xf32>
    %2 = vector.broadcast %1 : vector<4x1xf32> to vector<4x128xf32>
    %3 = arith.mulf %0, %2 : vector<4x128xf32>
    %cst = arith.constant dense<0.000000e+00> : vector<128xf32>
    %4 = vector.multi_reduction <add>, %3, %cst [0] : vector<4x128xf32> to vector<128xf32>
    %5 = vector.shape_cast %4 : vector<128xf32> to vector<1x128xf32>
    %c0_3 = arith.constant 0 : index
    %c0_4 = arith.constant 0 : index
    %6 = vector.load %arg3[%c0_3, %c0_4] : memref<1x1xf32, #tpu.memory_space<vmem>>, vector<1x1xf32>
    %7 = vector.broadcast %6 : vector<1x1xf32> to vector<1x128xf32>
    %8 = arith.addf %5, %7 : vector<1x128xf32>
    %cst_5 = arith.constant 0.000000e+00 : f32
    %9 = vector.broadcast %cst_5 : f32 to vector<1x128xf32>
    %10 = arith.subf %9, %8 : vector<1x128xf32>
    %11 = math.exp %10 : vector<1x128xf32>
    %cst_6 = arith.constant 1.000000e+00 : f32
    %12 = vector.broadcast %cst_6 : f32 to vector<1x128xf32>
    %13 = arith.addf %12, %11 : vector<1x128xf32>
    %14 = tpu.reciprocal %13 : vector<1x128xf32> -> vector<1x128xf32>
    %c0_7 = arith.constant 0 : index
    %c0_8 = arith.constant 0 : index
    %15 = vector.load %arg4[%c0_7, %c0_8] : memref<1x128xf32, #tpu.memory_space<vmem>>, vector<1x128xf32>
    tpu.vector_store %arg4[%c0_7, %c0_8], %14 {strides = array<i32>} : memref<1x128xf32, #tpu.memory_space<vmem>>, vector<1x128xf32>,
    return
  }
  func.func @transform_0(%arg0: i32) -> (i32, i32) {
    %c0_i32 = arith.constant 0 : i32
    %c0_i32_0 = arith.constant 0 : i32
    return %c0_i32, %arg0 : i32, i32
  }
  func.func @transform_1(%arg0: i32) -> (i32, i32) {
    %c0_i32 = arith.constant 0 : i32
    %c0_i32_0 = arith.constant 0 : i32
    %c0_i32_1 = arith.constant 0 : i32
    return %c0_i32, %c0_i32_0 : i32, i32
  }
  func.func @transform_2(%arg0: i32) -> (i32, i32) {
    %c0_i32 = arith.constant 0 : i32
    %c0_i32_0 = arith.constant 0 : i32
    %c0_i32_1 = arith.constant 0 : i32
    return %c0_i32, %c0_i32_0 : i32, i32
  }
  func.func @transform_3(%arg0: i32) -> (i32, i32) {
    %c0_i32 = arith.constant 0 : i32
    %c0_i32_0 = arith.constant 0 : i32
    return %c0_i32, %arg0 : i32, i32
  }
}

</mosaic_0001>

<bundles_post_ra>
// kernel: tpu_custom_call.1
= control target key start
LH: loop header
LB: loop body
LE: loop exit
PB: predicated region body
PF: predicated region fallthrough
CT: control target
= control target key end

     0   :  { %s143_s0 = inlined_call_operand.vmem [shape: f32[4,8], index: 0, kind: input, shape index: {}]   ;;  %s144_s1 = inlined_call_operand.vmem [shape: f32[4,1], index: 1, kind: input, shape index: {}]   ;;  %s145_s2 = inlined_call_operand.<no memory space> [shape: f32[1,1], index: 2, kind: input, shape index: {}]   ;;  %s146_s3 = inlined_call_operand.hbm [shape: f32[1,8], index: 3, kind: output, shape index: {}]  }
   0x1   :  { %v8_v0 = vstv %s145_s2 }
   0x2   :  { %9 = vst [vmem:[#allocation2] sm:$0x1] %v8_v0 }
   0x3   :  { %v18_v1 = vld [vmem:[%s144_s1] sm:$0xf]  ;;  %v109_v2 = vmov 0  }
   0x4   :  { %78 = vset.pattern.permute.xlu0 %v109_v2 }
   0x5   :  { %10 = vsyncpa [#allocation4], 0  ;;  %21 = vperm.xlu0 %78, %v18_v1   ;;  %v17_v4 = vld [vmem:[%s143_s0] sm:$0xf]  ;;  %vm25_vm0 = vcmask 1043456   ;;  %s110_s0 = smov [#allocation3]  }
   0x6   :  { %s65_s1 = sshll.u32 %s110_s0, 4  ;;  %s67_s19 = sshll.u32 %s146_s3, 4  ;;  %s66_s1 = int_to_ptr.vmem [resolvable:$true] %s65_s1  ;;  %s68_s19 = int_to_ptr.hbm [resolvable:$true] %s67_s19 }
   0x9   :  { %v33_v3 = vld [vmem:[#allocation2] sm:$0x1] }
   0xd   :  { %36 = vperm.xlu0 %78, %v33_v3  }
  0x77   :  { %v22_v5 = vpop.permute.xlu0 %21 }
  0x78   :  { %v24_v6 = vmul.f32 %v22_v5, %v17_v4 }
  0x7a   :  { %v26_v7 = vsel %vm25_vm0, %v24_v6, 0.0 }
  0x7b   :  { %v27_v8 = vrot.slane %v26_v7, 4 }
  0x7d   :  { %v28_v9 = vadd.f32 %v27_v8, %v26_v7 }
  0x7f   :  { %v29_v10 = vrot.slane %v28_v9, 2  ;;  %v37_v12 = vpop.permute.xlu0 %36 }
  0x80   :  { %v39_v15 = vperm.slane %v37_v12, 0 }
  0x81   :  { %v30_v11 = vadd.f32 %v29_v10, %v28_v9 }
  0x83   :  { %v31_v13 = vrot.slane %v30_v11, 1 }
  0x85   :  { %v32_v14 = vadd.f32 %v31_v13, %v30_v11 }
  0x87   :  { %v40_v16 = vadd.f32 %v39_v15, %v32_v14 }
  0x89   :  { %v41_v17 = vsub.f32 0.0, %v40_v16 }
  0x8b   :  { %v42_v18 = vmul.f32 1.442695, %v41_v17 }
  0x8d   :  { %79 = vpow2.f32 %v42_v18 }
  0x93   :  { %v80_v19 = vpop.eup %79 }
  0x94   :  { %v44_v20 = vadd.f32 1.0, %v80_v19 }
  0x96   :  { %81 = vrcp.f32 %v44_v20  ;;  %v56_v24 = vand.u32 2147483648, %v44_v20  ;;  %v54_v26 = vand.u32 2147483647, %v44_v20  ;;  %vm50_vm2 = vweird.f32 %v44_v20 }
  0x98   :  { %v57_v28 = vor.u32 1.1754944e-38, %v56_v24  ;;  %vm55_vm4 = vcmp.eq.f32.partialorder %v54_v26, 8.507059e+37 }
  0x9c   :  { %v82_v21 = vpop.eup %81 }
  0x9d   :  { %v46_v22 = vmul.f32 %v82_v21, %v44_v20  ;;  %vm51_vm1 = vweird.f32 %v82_v21 }
  0x9e   :  { %vm52_vm3 = vmor %vm50_vm2, %vm51_vm1 }
  0x9f   :  { %v47_v23 = vsub.f32 1.0, %v46_v22 }
  0xa1   :  { %v48_v25 = vmul.f32 %v82_v21, %v47_v23 }
  0xa3   :  { %v49_v27 = vadd.f32 %v82_v21, %v48_v25 }
  0xa5   :  { %v53_v29 = vsel %vm52_vm3, %v82_v21, %v49_v27 }
  0xa6   :  { %v58_v30 = vsel %vm55_vm4, %v57_v28, %v53_v29 }
  0xa7   :  { %59 = vst [vmem:[#allocation3] sm:$0x1] %v58_v30 }
  0xa8   :  { %70 = dma.vmem_to_hbm [thread:$0]  %s66_s1, 16, %s68_s19, [#allocation4]  }
  0xa9   :  { %107 = dma.done.wait [#allocation4], 16  }
  0xaa   :  { %108 = vsyncadd [#allocation4], 4294967280 }
  0xab   :  { %75 = vsyncpa [#allocation4], 1 }

</bundles_post_ra>
